<compile_context>
chip_gen: v7x
topology: tpu7x:2x2x1
jax: 0.10.0
libtpu: 0.0.40
codegen_flags: <defaults>
</compile_context>

<pallas_src>
import jax
import jax.numpy as jnp
from jax.experimental import pallas as pl
from jax.experimental.pallas import tpu as pltpu


def _sigmoid_kernel(x_ref, o_ref):
    # Elementwise sigmoid on the current tile. Compute in f32 (free: the op is
    # HBM-bound; matches PyTorch numerics for sub-f32 inputs); exp/reciprocal
    # lower to the EUP, which has its own bundle slot.
    x = x_ref[...]
    o_ref[...] = jax.nn.sigmoid(x.astype(jnp.float32)).astype(o_ref.dtype)


def _vmem_capacity_bytes():
    # Generation-aware sizing with a conservative fallback (v7x per-core VMEM).
    try:
        return int(getattr(pltpu.get_tpu_info(), "vmem_capacity_bytes", 64 << 20))
    except Exception:
        return 64 << 20


def _resolve_block_bytes(target_block_bytes):
    if target_block_bytes is not None:
        return int(target_block_bytes)
    vmem = _vmem_capacity_bytes()
    # Live footprint ~= 4x block (in + out, double-buffered). Keep it at
    # <= ~half of physical VMEM: 8 MiB blocks on v5e/v6e/v7x today.
    return int(max(4 << 20, min(8 << 20, vmem // 8)))


def _sigmoid_slab(xf, target_block_bytes):
    """Run the sigmoid kernel over a lane-dense 2-D slab (rows, lane)."""
    rows, lane = xf.shape
    dtype = xf.dtype
    itemsize = jnp.dtype(dtype).itemsize
    # Packed-sublane multiple: 8 for f32, 16 for bf16, 32 for int8/fp8.
    sub = max(8, 32 // itemsize)

    block_bytes_target = _resolve_block_bytes(target_block_bytes)
    if rows <= sub:
        # Single whole-slab block (block == full array dims is always legal).
        block_rows = rows
    else:
        tgt = max(sub, (block_bytes_target // (lane * itemsize)) // sub * sub)
        block_rows = min(tgt, rows)
        if block_rows == rows and rows >= 2 * sub:
            # Input fits one block but is splittable: use >= 2 grid steps so
            # both v7x TensorCores get work (neutral on single-TC v5e/v6e).
            block_rows = -(-((rows + 1) // 2) // sub) * sub

    grid = (pl.cdiv(rows, block_rows),)  # cdiv: partial tail block is masked

    block_bytes = block_rows * lane * itemsize
    # ~4x block live + headroom; cap at 48 MiB (safe under v7x's 64 MiB VMEM).
    vmem_limit = int(max(32 << 20, min(48 << 20, 6 * block_bytes)))

    n_slab = rows * lane
    return pl.pallas_call(
        _sigmoid_kernel,
        out_shape=jax.ShapeDtypeStruct((rows, lane), dtype),
        grid_spec=pltpu.PrefetchScalarGridSpec(
            num_scalar_prefetch=0,
            grid=grid,
            # NOTE(v5e): if a trace shows exposed DMA gaps, a third input
            # buffer (pipeline_mode=pl.Buffered(3)) is worth a sweep.
            in_specs=[pl.BlockSpec((block_rows, lane), lambda i: (i, 0))],
            out_specs=pl.BlockSpec((block_rows, lane), lambda i: (i, 0)),
        ),
        compiler_params=pltpu.CompilerParams(
            dimension_semantics=("parallel",),
            vmem_limit_bytes=vmem_limit,
        ),
        cost_estimate=pl.CostEstimate(
            flops=n_slab,
            transcendentals=n_slab,
            bytes_accessed=2 * n_slab * itemsize,
        ),
    )(xf)


def t_module_forward(x, *, target_block_bytes=None):
    """Forward of T_module: sigmoid(input), elementwise, any shape / float dtype."""
    orig_shape = x.shape
    dtype = x.dtype
    n = x.size
    if n == 0:
        return x
    flat = x.reshape(-1)

    # Widest lane-dense last dim that divides n -> long contiguous DMA bursts
    # and unmasked wide stores.
    lane = 128
    for cand in (1024, 512, 256):
        if n % cand == 0:
            lane = cand
            break

    n_main = (n // lane) * lane
    if n_main == 0:
        # Entire input is smaller than one lane row; a kernel launch is pure
        # overhead -- compute directly.
        return jax.nn.sigmoid(flat.astype(jnp.float32)).astype(dtype).reshape(orig_shape)

    if n_main == n:
        # Common case: pure reshape, no extra HBM round trip.
        out = _sigmoid_slab(flat.reshape(n // lane, lane), target_block_bytes)
        return out.reshape(orig_shape)

    # Ragged tail (n % lane != 0): run the multiple-of-lane prefix through the
    # kernel and only the (< lane)-element tail outside, instead of padding /
    # slicing the whole flattened array as before.
    # TODO(synk): a 1-D masked-tail BlockSpec could also remove the final concat copy.
    main = _sigmoid_slab(flat[:n_main].reshape(n_main // lane, lane), target_block_bytes)
    tail = jax.nn.sigmoid(flat[n_main:].astype(jnp.float32)).astype(dtype)
    return jnp.concatenate([main.reshape(-1), tail]).reshape(orig_shape)


if __name__ == "__main__":
    key = jax.random.PRNGKey(0)

    # Primary check: NCHW input, same convention as the PyTorch module.
    x = jax.random.normal(key, (2, 4, 16, 16), dtype=jnp.float32)
    y = t_module_forward(x)
    jax.block_until_ready(y)
    assert y.shape == x.shape and y.dtype == x.dtype
    assert float(jnp.max(jnp.abs(y - jax.nn.sigmoid(x)))) < 1e-5

    # Ragged-tail path: bulk through the kernel, < lane tail handled outside.
    x2 = jax.random.normal(jax.random.PRNGKey(0), (3, 5, 67), dtype=jnp.float32)
    y2 = t_module_forward(x2)
    jax.block_until_ready(y2)
    assert float(jnp.max(jnp.abs(y2 - jax.nn.sigmoid(x2)))) < 1e-5

    # Multi-step pipelined grid path (small block budget forces grid > 1).
    x3 = jax.random.normal(jax.random.PRNGKey(0), (2, 8, 64, 128), dtype=jnp.float32)
    y3 = t_module_forward(x3, target_block_bytes=128 * 1024)
    jax.block_until_ready(y3)
    assert float(jnp.max(jnp.abs(y3 - jax.nn.sigmoid(x3)))) < 1e-5

    # bf16: dtype-aware sublane rounding (16), in-kernel f32 compute, and the
    # >=2-grid-step split for inputs that would otherwise be a single block.
    x4 = jax.random.normal(jax.random.PRNGKey(0), (4, 256, 512), dtype=jnp.bfloat16)
    y4 = t_module_forward(x4)
    jax.block_until_ready(y4)
    ref4 = jax.nn.sigmoid(x4.astype(jnp.float32))
    assert y4.dtype == x4.dtype
    assert float(jnp.max(jnp.abs(y4.astype(jnp.float32) - ref4))) < 1e-2

    print("KERNEL_OK")
</pallas_src>

<mosaic_0001>
module attributes {stable_mosaic.version = 11 : i64} {
  func.func @_sigmoid_kernel(%arg0: i32, %arg1: memref<2x1024xf32, #tpu.memory_space<vmem>>, %arg2: memref<2x1024xf32, #tpu.memory_space<vmem>>) attributes {dimension_semantics = [#tpu.dimension_semantics<parallel>], iteration_bounds = array<i64: 1>, scalar_prefetch = 0 : i64, scratch_operands = 0 : i64, tpu.core_type = #tpu.core_type<tc>, window_params = [{transform_indices = @transform_0, window_bounds = array<i64: 2, 1024>}, {transform_indices = @transform_1, window_bounds = array<i64: 2, 1024>}]} {
    %c0 = arith.constant 0 : index
    %c0_0 = arith.constant 0 : index
    %0 = vector.load %arg1[%c0, %c0_0] : memref<2x1024xf32, #tpu.memory_space<vmem>>, vector<2x1024xf32>
    %1 = arith.negf %0 : vector<2x1024xf32>
    %2 = math.exp %1 : vector<2x1024xf32>
    %cst = arith.constant 1.000000e+00 : f32
    %3 = vector.broadcast %cst : f32 to vector<2x1024xf32>
    %4 = arith.addf %3, %2 : vector<2x1024xf32>
    %5 = arith.divf %3, %4 : vector<2x1024xf32>
    %c0_1 = arith.constant 0 : index
    %c0_2 = arith.constant 0 : index
    %6 = vector.load %arg2[%c0_1, %c0_2] : memref<2x1024xf32, #tpu.memory_space<vmem>>, vector<2x1024xf32>
    tpu.vector_store %arg2[%c0_1, %c0_2], %5 {strides = array<i32>} : memref<2x1024xf32, #tpu.memory_space<vmem>>, vector<2x1024xf32>,
    return
  }
  func.func @transform_0(%arg0: i32) -> (i32, i32) {
    %c0_i32 = arith.constant 0 : i32
    %c0_i32_0 = arith.constant 0 : i32
    return %arg0, %c0_i32 : i32, i32
  }
  func.func @transform_1(%arg0: i32) -> (i32, i32) {
    %c0_i32 = arith.constant 0 : i32
    %c0_i32_0 = arith.constant 0 : i32
    return %arg0, %c0_i32 : i32, i32
  }
}

</mosaic_0001>

<bundles_post_ra>
// kernel: tpu_custom_call.1
= control target key start
LH: loop header
LB: loop body
LE: loop exit
PB: predicated region body
PF: predicated region fallthrough
CT: control target
= control target key end

     0   :  { %6 = vsyncpa [#allocation3], 0  ;;  %s148_s0 = inlined_call_operand.hbm [shape: f32[2,1024], index: 0, kind: input, shape index: {}]   ;;  %s149_s1 = inlined_call_operand.hbm [shape: f32[2,1024], index: 1, kind: output, shape index: {}]  }
   0x1   :  { %7 = vsyncpa [#allocation4], 0  ;;  %s112_s6 = smov [#allocation2]   ;;  %s64_s10 = scalar_lea.hbm %s148_s0, 256 }
   0x2   :  { %s14_s7 = sshll.u32 %s112_s6, 4  ;;  %p65_p0 = scmp.ne.s32.totalorder %s148_s0, %s64_s10  ;;  %s15_s7 = int_to_ptr.vmem [resolvable:$true] %s14_s7 }
   0x3   :  { %p68_p1 = scmp.lt.u32.totalorder %s64_s10, %s148_s0 }
   0x5   :  { %p70_p2 = pnand %p68_p1, %p65_p0 }
   0x7   :  { %73 = shalt.err (!%p70_p2)
}
   0x8   :  { %s74_s15 = scalar_lea.vmem %s15_s7, 256  ;;  %p79_p4 = scmp.lt.s32.totalorder %s15_s7, %s15_s7 }
   0x9   :  { %p75_p3 = scmp.ne.s32.totalorder %s15_s7, %s74_s15  ;;  %p80_p5 = scmp.lt.s32.totalorder %s74_s15, %s74_s15 }
   0xb   :  { %p81_p6 = por %p80_p5, %p79_p4 }
   0xd   :  { %p82_p7 = pnand %p81_p6, %p75_p3 }
   0xf   :  { %85 = shalt.err (!%p82_p7)
}
  0x10   :  { %17 = dma.hbm_to_vmem [thread:$0]  %s148_s0, 256, %s15_s7, [#allocation3]  }
  0x11   :  { %108 = dma.done.wait [#allocation3], 256  }
  0x12   :  { %109 = vsyncadd [#allocation3], 4294967040  ;;  %v21_v0 = vld [vmem:[#allocation2] sm:$0xff]  ;;  %v22_v1 = vld [vmem:[#allocation2 + $0x8] sm:$0xff]  ;;  %s113_s18 = smov [#allocation5]  }
  0x13   :  { %v52_v2 = vmul.f32 -1.442695, %v21_v0  ;;  %v53_v3 = vmul.f32 -1.442695, %v22_v1  ;;  %s43_s19 = sshll.u32 %s113_s18, 4  ;;  %s44_s19 = int_to_ptr.vmem [resolvable:$true] %s43_s19 }
  0x14   :  { %s86_s0 = scalar_lea.vmem %s44_s19, 256  ;;  %p91_p9 = scmp.lt.s32.totalorder %s44_s19, %s44_s19 }
  0x15   :  { %56 = vpow2.f32 %v52_v2  ;;  %p87_p8 = scmp.ne.s32.totalorder %s44_s19, %s86_s0  ;;  %p92_p10 = scmp.lt.s32.totalorder %s86_s0, %s86_s0 }
  0x16   :  { %58 = vpow2.f32 %v53_v3 }
  0x17   :  { %p93_p11 = por %p92_p10, %p91_p9 }
  0x19   :  { %p94_p12 = pnand %p93_p11, %p87_p8 }
  0x1f   :  { %v57_v4 = vpop.eup %56 }
  0x20   :  { %v59_v5 = vpop.eup %58  ;;  %v29_v6 = vadd.f32 1.0, %v57_v4 }
  0x21   :  { %v30_v7 = vadd.f32 1.0, %v59_v5 }
  0x22   :  { %60 = vrcp.f32 %v29_v6 }
  0x23   :  { %62 = vrcp.f32 %v30_v7 }
  0x2c   :  { %v61_v8 = vpop.eup %60 }
  0x2d   :  { %v63_v9 = vpop.eup %62  ;;  %35 = vst [vmem:[#allocation5] sm:$0xff] %v61_v8 }
  0x2e   :  { %36 = vst [vmem:[#allocation5 + $0x8] sm:$0xff] %v63_v9 }
  0x2f   :  { %97 = shalt.err (!%p94_p12)
}
  0x30   :  { %s98_s22 = scalar_lea.hbm %s149_s1, 256 }
  0x31   :  { %p99_p13 = scmp.ne.s32.totalorder %s149_s1, %s98_s22  ;;  %p102_p0 = scmp.lt.u32.totalorder %s98_s22, %s149_s1 }
  0x33   :  { %p104_p1 = pnand %p102_p0, %p99_p13 }
  0x35   :  { %107 = shalt.err (!%p104_p1)
}
  0x36   :  { %46 = dma.vmem_to_hbm [thread:$0]  %s44_s19, 256, %s149_s1, [#allocation4]  }
  0x37   :  { %110 = dma.done.wait [#allocation4], 256  }
  0x38   :  { %111 = vsyncadd [#allocation4], 4294967040 }
  0x39   :  { %50 = vsyncpa [#allocation3], 1 }
  0x3a   :  { %51 = vsyncpa [#allocation4], 1 }

</bundles_post_ra>
